<compile_context>
chip_gen: v7x
topology: tpu7x:2x2x1
jax: 0.10.0
libtpu: 0.0.40
codegen_flags: <defaults>
</compile_context>

<pallas_src>
import functools

import jax
import jax.numpy as jnp
from jax.experimental import pallas as pl
from jax.experimental.pallas import tpu as pltpu


def _round_up(x, m):
    return ((x + m - 1) // m) * m


def _pad2(x, rows, cols):
    pr, pc = rows - x.shape[0], cols - x.shape[1]
    if pr == 0 and pc == 0:
        return x
    return jnp.pad(x, ((0, pr), (0, pc)))


def _vmem_limit(nbytes):
    """Requested (double-buffered) footprint + compiler headroom, capped well
    under v7x's 64 MiB per-TensorCore VMEM (v5e/v6e have 128 MiB)."""
    return int(min(max(int(nbytes) + (8 << 20), 16 << 20), 48 << 20))


def _choose_tiles(N, tile_m, tile_k):
    """Row tile (multiple of 128, >=2 row blocks when possible for megacore) and
    a large column tile that is a multiple of 128 and divides the padded N."""
    tile_m = max(128, (int(tile_m) // 128) * 128)
    n128 = _round_up(N, 128)
    tile_m = min(tile_m, n128)
    n_pad = _round_up(N, tile_m)
    if n_pad // tile_m < 2 and n_pad >= 256:      # keep both v7x TCs busy
        tile_m = max(128, (n_pad // 2 // 128) * 128)
        n_pad = _round_up(N, tile_m)
    units = n_pad // 128
    best = 1
    for d in range(1, units + 1):
        if units % d == 0 and d * 128 <= max(int(tile_k), 128):
            best = d
    return tile_m, best * 128, n_pad


def _leaky02(v):  # att_act = LeakyReLU(negative_slope=0.2)
    return jnp.where(v >= 0.0, v, 0.2 * v)


# ---------------------------------------------------------------------------
# Kernel 1: fused projections + per-head neighbor attention logits.
#   h = relu(x @ [W_self | W_neigh] + [b_self | b_neigh])   (one 128-wide store)
#   a[:, k] = leakyrelu( h_neigh_head_k . att_neigh_k )     (one matmul, all heads)
# ---------------------------------------------------------------------------
def _proj_kernel(x_ref, w_ref, b_ref, attn_ref, h_ref, a_ref, *, dim_out):
    h = jnp.dot(x_ref[...], w_ref[...], preferred_element_type=jnp.float32)
    h = jnp.maximum(h + b_ref[...], 0.0)                      # act = ReLU
    h_ref[...] = h                                            # [tile, 2*dim_out]
    a = jnp.dot(h[:, dim_out:], attn_ref[...],
                preferred_element_type=jnp.float32)
    a_ref[...] = _leaky02(a)                                  # [tile, mulhead]


# ---------------------------------------------------------------------------
# Kernel 2: column weights  g = exp(a - global_max)  and the fused RHS
#   rhs = [ g_0*fn_0 | ... | g_0 | g_1 | ... | 0-pad ]   (one store, agg dtype)
# ---------------------------------------------------------------------------
def _weight_kernel(h_ref, a_ref, m_ref, expand_ref, rhs_ref,
                   *, dim_out, dA_pad, mulhead):
    g = jnp.exp(a_ref[...] - m_ref[...])                      # [tile, H], <= 1
    ge = jnp.dot(g, expand_ref[...],                          # per-head broadcast
                 preferred_element_type=jnp.float32)          # [tile, dim_out]
    hn = h_ref[:, dim_out:]
    parts = [hn * ge, g]
    pad = dA_pad - dim_out - mulhead
    if pad:
        parts.append(jnp.zeros((g.shape[0], pad), jnp.float32))
    rhs_ref[...] = jnp.concatenate(parts, axis=1).astype(rhs_ref.dtype)


# ---------------------------------------------------------------------------
# Kernel 3: attention aggregation + norm_feat + head combine.
#   grid = (row blocks [parallel], column blocks [arbitrary])
#   acc += adj_block @ rhs_block   (numerators for all heads + denominators)
#   finalize: agg = num * recip(den); vectorized per-head norm via expand
#   matmuls; one lane-dense [tile, dim_out] store.
# ---------------------------------------------------------------------------
def _agg_kernel(adj_ref, rhs_ref, h_ref, scale_ref, offset_ref,
                expand_ref, expandt_ref, out_ref, acc_ref,
                *, mulhead, dim_out, inv_ds, tile_k, rhs_resident):
    kcol = pl.program_id(1)

    @pl.when(kcol == 0)
    def _():
        acc_ref[...] = jnp.zeros_like(acc_ref)

    if rhs_resident:
        start = pl.multiple_of(kcol * tile_k, 128)
        rhs_blk = rhs_ref[pl.ds(start, tile_k), :]
    else:
        rhs_blk = rhs_ref[...]
    acc_ref[...] += jnp.dot(adj_ref[...], rhs_blk,
                            preferred_element_type=jnp.float32)

    @pl.when(kcol == pl.num_programs(1) - 1)
    def _():
        acc = acc_ref[...]                               # [tile, dA_pad] f32
        expand = expand_ref[...]                         # [H, dim_out]
        expand_t = expandt_ref[...]                      # [dim_out, H]

        den = jnp.maximum(acc[:, dim_out:dim_out + mulhead], 1e-10)
        recip = pl.reciprocal(den, approx=True)          # EUP, error cancels in norm
        agg = acc[:, :dim_out] * jnp.dot(recip, expand,
                                         preferred_element_type=jnp.float32)
        hs = h_ref[:, :dim_out]                          # self half of h_cat

        def seg_norm(v, scale_row, offset_row):
            # per-head mean / var over 16-lane slices via expand matmuls (MXU)
            mean = jnp.dot(v, expand_t,
                           preferred_element_type=jnp.float32) * inv_ds
            mean_b = jnp.dot(mean, expand, preferred_element_type=jnp.float32)
            c = v - mean_b
            var = jnp.dot(c * c, expand_t,
                          preferred_element_type=jnp.float32) * inv_ds + 1e-9
            rstd_b = jnp.dot(jax.lax.rsqrt(var), expand,
                             preferred_element_type=jnp.float32)
            return c * scale_row * rstd_b + offset_row

        # feat_l = [neigh, self]  ->  scale/offset row 0 = neigh, row 1 = self
        out = 0.5 * (seg_norm(hs, scale_ref[1:2, :], offset_ref[1:2, :]) +
                     seg_norm(agg, scale_ref[0:1, :], offset_ref[0:1, :]))
        out_ref[...] = out.astype(out_ref.dtype)         # single lane-dense store


# ---------------------------------------------------------------------------
# Wrapper
# ---------------------------------------------------------------------------
def gat_forward(feat_in, adj_dense, params, mulhead, *, tile_m=256, tile_k=2048,
                agg_dtype=jnp.bfloat16, rhs_resident=None):
    """Returns (feat_out, adj, True, 0.0) matching GAT.forward semantics."""
    N, dim_in = feat_in.shape
    dim_out = params["w_self"].shape[1]
    dim_slice = dim_out // mulhead
    H = mulhead
    dA = dim_out + H
    agg_isz = jnp.dtype(agg_dtype).itemsize
    f32 = 4

    tile_m, tile_k, n_pad = _choose_tiles(N, tile_m, tile_k)
    nb_m, nb_k = n_pad // tile_m, n_pad // tile_k

    # rhs is VMEM-resident in pass 3 if it fits a conservative budget (assume a
    # possible second pipeline buffer); pad its lane width to 128 only then.
    if rhs_resident is None:
        rhs_resident = n_pad * _round_up(dA, 128) * agg_isz <= (12 << 20)
    dA_pad = _round_up(dA, 128) if rhs_resident else dA

    x = _pad2(feat_in.astype(jnp.float32), n_pad, dim_in)
    adj_p = _pad2(adj_dense, n_pad, n_pad).astype(agg_dtype)

    # Fused parameter packing (pure layout plumbing).
    w_cat = jnp.concatenate([params["w_self"], params["w_neigh"]],
                            axis=1).astype(jnp.float32)
    b_cat = jnp.concatenate([params["b_self"], params["b_neigh"]]
                            ).reshape(1, -1).astype(jnp.float32)
    # expand[k, k*ds:(k+1)*ds] = 1  : broadcasts per-head scalars over head slices
    expand = jnp.repeat(jnp.eye(H, dtype=jnp.float32), dim_slice, axis=1)
    expand_t = expand.T
    # Block-diagonal neighbor-attention matrix [dim_out, mulhead].
    att_neigh = expand_t * params["attention"][1].reshape(-1, 1)
    # NOTE: params["attention"][0] (self term) cancels in the per-row softmax
    # (constant within a row), so it never enters the kernels.
    scale2 = params["scale"].reshape(2, dim_out).astype(jnp.float32)
    offset2 = params["offset"].reshape(2, dim_out).astype(jnp.float32)

    # ---- pass 1: projections + attention logits (row blocks, parallel) ----
    lim1 = _vmem_limit(2 * (tile_m * dim_in + dim_in * 2 * dim_out + 2 * dim_out
                            + dim_out * H + tile_m * 2 * dim_out
                            + tile_m * H) * f32)
    h_cat, a_neigh = pl.pallas_call(
        functools.partial(_proj_kernel, dim_out=dim_out),
        out_shape=(jax.ShapeDtypeStruct((n_pad, 2 * dim_out), jnp.float32),
                   jax.ShapeDtypeStruct((n_pad, H), jnp.float32)),
        grid_spec=pltpu.PrefetchScalarGridSpec(
            num_scalar_prefetch=0, grid=(nb_m,),
            in_specs=[pl.BlockSpec((tile_m, dim_in), lambda i: (i, 0)),
                      pl.BlockSpec((dim_in, 2 * dim_out), lambda i: (0, 0)),
                      pl.BlockSpec((1, 2 * dim_out), lambda i: (0, 0)),
                      pl.BlockSpec((dim_out, H), lambda i: (0, 0))],
            out_specs=[pl.BlockSpec((tile_m, 2 * dim_out), lambda i: (i, 0)),
                       pl.BlockSpec((tile_m, H), lambda i: (i, 0))]),
        compiler_params=pltpu.CompilerParams(
            dimension_semantics=("parallel",), vmem_limit_bytes=lim1),
    )(x, w_cat, b_cat, att_neigh)

    # Global per-head max (tiny O(N*H) reduce). Any per-head constant cancels in
    # the softmax ratio; the global max keeps every exp <= 1 (overflow-safe).
    m = jnp.max(a_neigh[:N], axis=0, keepdims=True)

    # ---- pass 2: column weights + fused RHS (row blocks, parallel) ----
    lim2 = _vmem_limit(2 * ((tile_m * 2 * dim_out + tile_m * H + H
                             + H * dim_out) * f32 + tile_m * dA_pad * agg_isz))
    rhs = pl.pallas_call(
        functools.partial(_weight_kernel, dim_out=dim_out, dA_pad=dA_pad,
                          mulhead=H),
        out_shape=jax.ShapeDtypeStruct((n_pad, dA_pad), agg_dtype),
        grid_spec=pltpu.PrefetchScalarGridSpec(
            num_scalar_prefetch=0, grid=(nb_m,),
            in_specs=[pl.BlockSpec((tile_m, 2 * dim_out), lambda i: (i, 0)),
                      pl.BlockSpec((tile_m, H), lambda i: (i, 0)),
                      pl.BlockSpec((1, H), lambda i: (0, 0)),
                      pl.BlockSpec((H, dim_out), lambda i: (0, 0))],
            out_specs=pl.BlockSpec((tile_m, dA_pad), lambda i: (i, 0))),
        compiler_params=pltpu.CompilerParams(
            dimension_semantics=("parallel",), vmem_limit_bytes=lim2),
    )(h_cat, a_neigh, m, expand)

    # ---- pass 3: aggregation + norm + combine (rows parallel, cols arbitrary) ----
    rhs_bytes = (n_pad if rhs_resident else tile_k) * dA_pad * agg_isz
    lim3 = _vmem_limit(2 * (tile_m * tile_k * agg_isz + rhs_bytes
                            + (tile_m * 2 * dim_out + 4 * dim_out
                               + 2 * H * dim_out + tile_m * dim_out) * f32)
                       + tile_m * dA_pad * f32)
    if rhs_resident:
        rhs_spec = pl.BlockSpec((n_pad, dA_pad), lambda i, k: (0, 0))
    else:
        rhs_spec = pl.BlockSpec((tile_k, dA_pad), lambda i, k: (k, 0))

    out_full = pl.pallas_call(
        functools.partial(_agg_kernel, mulhead=H, dim_out=dim_out,
                          inv_ds=1.0 / dim_slice, tile_k=tile_k,
                          rhs_resident=rhs_resident),
        out_shape=jax.ShapeDtypeStruct((n_pad, dim_out), jnp.float32),
        grid_spec=pltpu.PrefetchScalarGridSpec(
            num_scalar_prefetch=0, grid=(nb_m, nb_k),
            in_specs=[pl.BlockSpec((tile_m, tile_k), lambda i, k: (i, k)),
                      rhs_spec,
                      pl.BlockSpec((tile_m, 2 * dim_out), lambda i, k: (i, 0)),
                      pl.BlockSpec((2, dim_out), lambda i, k: (0, 0)),
                      pl.BlockSpec((2, dim_out), lambda i, k: (0, 0)),
                      pl.BlockSpec((H, dim_out), lambda i, k: (0, 0)),
                      pl.BlockSpec((dim_out, H), lambda i, k: (0, 0))],
            out_specs=pl.BlockSpec((tile_m, dim_out), lambda i, k: (i, 0)),
            scratch_shapes=[pltpu.VMEM((tile_m, dA_pad), jnp.float32)]),
        compiler_params=pltpu.CompilerParams(
            dimension_semantics=("parallel", "arbitrary"),
            vmem_limit_bytes=lim3),
    )(adj_p, rhs, h_cat, scale2, offset2, expand, expand_t)

    feat_out = out_full[:N]
    return feat_out, adj_dense, True, 0.0


# ---------------------------------------------------------------------------
# Pure-JAX reference of the original (torch) algorithm, for correctness check.
# ---------------------------------------------------------------------------
def gat_reference(feat_in, adj, params, mulhead):
    dim_out = params["w_self"].shape[1]
    ds = dim_out // mulhead
    h_self = jnp.maximum(feat_in @ params["w_self"] + params["b_self"], 0.0)
    h_neigh = jnp.maximum(feat_in @ params["w_neigh"] + params["b_neigh"], 0.0)
    att, scale, offset = params["attention"], params["scale"], params["offset"]

    def leaky(v):
        return jnp.where(v >= 0.0, v, 0.2 * v)

    def norm_feat(v, s, o):
        mean = jnp.mean(v, axis=1, keepdims=True)
        var = jnp.mean((v - mean) ** 2, axis=1, keepdims=True) + 1e-9
        return (v - mean) * s * jax.lax.rsqrt(var) + o

    mask = adj != 0.0
    outs = []
    for k in range(mulhead):
        fs = h_self[:, k * ds:(k + 1) * ds]
        fn = h_neigh[:, k * ds:(k + 1) * ds]
        a_s = leaky(fs @ att[0, k])
        a_n = leaky(fn @ att[1, k])
        s_mat = a_s[:, None] + a_n[None, :]
        mrow = jnp.max(jnp.where(mask, s_mat, -jnp.inf), axis=1, keepdims=True)
        mrow = jnp.where(mrow > -1e30, mrow, 0.0)
        e_mat = jnp.where(mask, jnp.exp(s_mat - mrow), 0.0) * adj
        denom = jnp.maximum(jnp.sum(e_mat, axis=1, keepdims=True), 1e-10)
        agg = (e_mat @ fn) / denom
        outs.append(0.5 * (norm_feat(fs, scale[1, k], offset[1, k]) +
                           norm_feat(agg, scale[0, k], offset[0, k])))
    return jnp.concatenate(outs, axis=1)


if __name__ == "__main__":
    N, dim_in, dim_out, mulhead = 200, 64, 64, 4
    dim_slice = dim_out // mulhead

    key = jax.random.PRNGKey(0)
    kf, ka, kw0, kb0, kw1, kb1, katt, kmask, ksc, kof = jax.random.split(key, 10)

    feat_in = jax.random.normal(kf, (N, dim_in), dtype=jnp.float32)

    # Dense adjacency with ~30% edges, positive normalized edge weights.
    edge_mask = jax.random.bernoulli(kmask, 0.3, (N, N)).astype(jnp.float32)
    edge_vals = jax.random.uniform(ka, (N, N), jnp.float32, minval=0.1, maxval=1.0)
    adj_dense = edge_mask * edge_vals

    params = {
        # nn.Linear(dim_in, dim_out): y = x @ W^T + b; W stored transposed.
        "w_self": jax.random.normal(kw0, (dim_in, dim_out), jnp.float32) * 0.1,
        "b_self": jax.random.normal(kb0, (dim_out,), jnp.float32) * 0.1,
        "w_neigh": jax.random.normal(kw1, (dim_in, dim_out), jnp.float32) * 0.1,
        "b_neigh": jax.random.normal(kb1, (dim_out,), jnp.float32) * 0.1,
        "attention": jax.random.uniform(katt, (2, mulhead, dim_slice), jnp.float32,
                                        minval=-0.5, maxval=0.5),
        # Non-trivial norm_feat params so head / self-vs-neigh indexing bugs are caught.
        "scale": 1.0 + 0.1 * jax.random.normal(ksc, (2, mulhead, dim_slice), jnp.float32),
        "offset": 0.1 * jax.random.normal(kof, (2, mulhead, dim_slice), jnp.float32),
    }

    ref = gat_reference(feat_in, adj_dense, params, mulhead)

    # Strict f32 check: tile_m=tile_k=128 gives a 2x2 grid (parallel row axis,
    # arbitrary column-accumulation axis, padding) with the streaming-rhs path.
    out32, _, is_normed, dropedge = gat_forward(
        feat_in, adj_dense, params, mulhead,
        tile_m=128, tile_k=128, agg_dtype=jnp.float32, rhs_resident=False)
    out32 = jax.block_until_ready(out32)
    assert out32.shape == (N, dim_out)
    err32 = float(jnp.max(jnp.abs(out32 - ref)))
    assert err32 < 2e-3, f"f32 path mismatch vs reference: max abs err = {err32}"

    # Default perf path: bf16 adjacency/rhs, auto tiles, VMEM-resident rhs.
    out16, _, _, _ = gat_forward(feat_in, adj_dense, params, mulhead)
    out16 = jax.block_until_ready(out16)
    assert out16.shape == (N, dim_out)
    err16 = float(jnp.max(jnp.abs(out16 - ref)))
    assert err16 < 1e-1, f"bf16 path mismatch vs reference: max abs err = {err16}"

    print("KERNEL_OK")
</pallas_src>

<mosaic_0001>
module attributes {stable_mosaic.version = 11 : i64} {
  func.func @_proj_kernel(%arg0: i32, %arg1: memref<128x64xf32, #tpu.memory_space<vmem>>, %arg2: memref<64x128xf32, #tpu.memory_space<vmem>>, %arg3: memref<1x128xf32, #tpu.memory_space<vmem>>, %arg4: memref<64x4xf32, #tpu.memory_space<vmem>>, %arg5: memref<128x128xf32, #tpu.memory_space<vmem>>, %arg6: memref<128x4xf32, #tpu.memory_space<vmem>>) attributes {dimension_semantics = [#tpu.dimension_semantics<parallel>], iteration_bounds = array<i64: 2>, scalar_prefetch = 0 : i64, scratch_operands = 0 : i64, tpu.core_type = #tpu.core_type<tc>, window_params = [{transform_indices = @transform_0, window_bounds = array<i64: 128, 64>}, {pipeline_mode = #tpu.pipeline_mode<synchronous>, transform_indices = @transform_1, window_bounds = array<i64: 64, 128>}, {pipeline_mode = #tpu.pipeline_mode<synchronous>, transform_indices = @transform_2, window_bounds = array<i64: 1, 128>}, {pipeline_mode = #tpu.pipeline_mode<synchronous>, transform_indices = @transform_3, window_bounds = array<i64: 64, 4>}, {transform_indices = @transform_4, window_bounds = array<i64: 128, 128>}, {transform_indices = @transform_5, window_bounds = array<i64: 128, 4>}]} {
    %c0 = arith.constant 0 : index
    %c0_0 = arith.constant 0 : index
    %0 = vector.load %arg1[%c0, %c0_0] : memref<128x64xf32, #tpu.memory_space<vmem>>, vector<128x64xf32>
    %c0_1 = arith.constant 0 : index
    %c0_2 = arith.constant 0 : index
    %1 = vector.load %arg2[%c0_1, %c0_2] : memref<64x128xf32, #tpu.memory_space<vmem>>, vector<64x128xf32>
    %cst = arith.constant dense<0.000000e+00> : vector<128x128xf32>
    %2 = tpu.matmul %0, %1, %cst {dimension_numbers = #tpu.dot_dimension_numbers<[1], [0], [0], [1], [0, 0, 1, 1], [], []>} : vector<128x64xf32>, vector<64x128xf32>, vector<128x128xf32> -> vector<128x128xf32>
    %c0_3 = arith.constant 0 : index
    %c0_4 = arith.constant 0 : index
    %3 = vector.load %arg3[%c0_3, %c0_4] : memref<1x128xf32, #tpu.memory_space<vmem>>, vector<1x128xf32>
    %4 = vector.broadcast %3 : vector<1x128xf32> to vector<128x128xf32>
    %5 = arith.addf %2, %4 : vector<128x128xf32>
    %cst_5 = arith.constant 0.000000e+00 : f32
    %6 = vector.broadcast %cst_5 : f32 to vector<128x128xf32>
    %7 = arith.maximumf %5, %6 : vector<128x128xf32>
    %c0_6 = arith.constant 0 : index
    %c0_7 = arith.constant 0 : index
    %8 = vector.load %arg5[%c0_6, %c0_7] : memref<128x128xf32, #tpu.memory_space<vmem>>, vector<128x128xf32>
    tpu.vector_store %arg5[%c0_6, %c0_7], %7 {strides = array<i32>} : memref<128x128xf32, #tpu.memory_space<vmem>>, vector<128x128xf32>,
    %9 = vector.extract_strided_slice %7 {offsets = [0, 64], sizes = [128, 64], strides = [1, 1]} : vector<128x128xf32> to vector<128x64xf32>
    %c0_8 = arith.constant 0 : index
    %c0_9 = arith.constant 0 : index
    %10 = vector.load %arg4[%c0_8, %c0_9] : memref<64x4xf32, #tpu.memory_space<vmem>>, vector<64x4xf32>
    %cst_10 = arith.constant dense<0.000000e+00> : vector<128x4xf32>
    %11 = tpu.matmul %9, %10, %cst_10 {dimension_numbers = #tpu.dot_dimension_numbers<[1], [0], [0], [1], [0, 0, 1, 1], [], []>} : vector<128x64xf32>, vector<64x4xf32>, vector<128x4xf32> -> vector<128x4xf32>
    %cst_11 = arith.constant 0.000000e+00 : f32
    %12 = vector.broadcast %cst_11 : f32 to vector<128x4xf32>
    %13 = arith.cmpf oge, %11, %12 : vector<128x4xf32>
    %cst_12 = arith.constant 2.000000e-01 : f32
    %14 = vector.broadcast %cst_12 : f32 to vector<128x4xf32>
    %15 = arith.mulf %14, %11 : vector<128x4xf32>
    %16 = arith.select %13, %11, %15 : vector<128x4xi1>, vector<128x4xf32>
    %c0_13 = arith.constant 0 : index
    %c0_14 = arith.constant 0 : index
    %17 = vector.load %arg6[%c0_13, %c0_14] : memref<128x4xf32, #tpu.memory_space<vmem>>, vector<128x4xf32>
    tpu.vector_store %arg6[%c0_13, %c0_14], %16 {strides = array<i32>} : memref<128x4xf32, #tpu.memory_space<vmem>>, vector<128x4xf32>,
    return
  }
  func.func @transform_0(%arg0: i32) -> (i32, i32) {
    %c0_i32 = arith.constant 0 : i32
    %c0_i32_0 = arith.constant 0 : i32
    return %arg0, %c0_i32 : i32, i32
  }
  func.func @transform_1(%arg0: i32) -> (i32, i32) {
    %c0_i32 = arith.constant 0 : i32
    %c0_i32_0 = arith.constant 0 : i32
    %c0_i32_1 = arith.constant 0 : i32
    return %c0_i32, %c0_i32_0 : i32, i32
  }
  func.func @transform_2(%arg0: i32) -> (i32, i32) {
    %c0_i32 = arith.constant 0 : i32
    %c0_i32_0 = arith.constant 0 : i32
    %c0_i32_1 = arith.constant 0 : i32
    return %c0_i32, %c0_i32_0 : i32, i32
  }
  func.func @transform_3(%arg0: i32) -> (i32, i32) {
    %c0_i32 = arith.constant 0 : i32
    %c0_i32_0 = arith.constant 0 : i32
    %c0_i32_1 = arith.constant 0 : i32
    return %c0_i32, %c0_i32_0 : i32, i32
  }
  func.func @transform_4(%arg0: i32) -> (i32, i32) {
    %c0_i32 = arith.constant 0 : i32
    %c0_i32_0 = arith.constant 0 : i32
    return %arg0, %c0_i32 : i32, i32
  }
  func.func @transform_5(%arg0: i32) -> (i32, i32) {
    %c0_i32 = arith.constant 0 : i32
    %c0_i32_0 = arith.constant 0 : i32
    return %arg0, %c0_i32 : i32, i32
  }
}

</mosaic_0001>

<bundles_post_ra>
// kernel: tpu_custom_call.1
= control target key start
LH: loop header
LB: loop body
LE: loop exit
PB: predicated region body
PF: predicated region fallthrough
CT: control target
= control target key end

     0   :  { %11 = vsyncpa [#allocation3], 0  ;;  %s1557_s0 = inlined_call_operand.vmem [shape: f32[256,64], index: 0, kind: input, shape index: {}]   ;;  %s1558_s1 = inlined_call_operand.vmem [shape: f32[64,128], index: 1, kind: input, shape index: {}]   ;;  %s1559_s2 = inlined_call_operand.vmem [shape: f32[1,128], index: 2, kind: input, shape index: {}]   ;;  %s1560_s3 = inlined_call_operand.vmem [shape: f32[64,4], index: 3, kind: input, shape index: {}]   ;;  %s1561_s4 = inlined_call_operand.hbm [shape: f32[256,128], index: 4, kind: output, shape index: {0}]   ;;  %s1562_s5 = inlined_call_operand.vmem [shape: f32[256,4], index: 5, kind: output, shape index: {1}]  }
   0x1   :  { %13 = vsyncpa [#allocation3 + $0x1], 0  ;;  %s1253_s18 = smov 0   ;;  %s1255_s19 = smov 0  }
   0x2   :  { %s1257_s20 = smov 0   ;;  %s1259_s21 = smov 0  }
   0x3 LB: > { %s1274_s22 = sadd.s32 4294967295, %s1217_s21   ;;  %s905_s23 = sadd.s32 4294967294, %s1217_s21   ;;  %s1217_s21 = sphi %s1259_s21, %s1568_s21   ;;  %s1213_s20 = sphi %s1257_s20, %s1567_s20   ;;  %s1209_s19 = sphi %s1255_s19, %s1566_s19   ;;  %s1205_s18 = sphi %s1253_s18, %s1565_s18  }
   0x4   : > { %s1278_s24 = sadd.s32 1, %s1217_s21   ;;  %s115_s25 = sadd.s32 1, %s1213_s20 }
   0x5   : > { %s112_s26 = ssub.s32 %s1217_s21, %s1278_s24  ;;  %p125_p0 = scmp.ne.s32.totalorder %s1213_s20, %s1209_s19 }
   0x6   : > { %p113_p1 = scmp.eq.s32.totalorder %s112_s26, 0  ;;  %p126_p2 = scmp.eq.s32.totalorder %s1274_s22, 1 }
   0x7   : > { %p131_p3 = scmp.ne.s32.totalorder %s1209_s19, %s1205_s18  ;;  %p132_p4 = scmp.eq.s32.totalorder %s905_s23, 1 }
   0x8   : > { %s1289_s27 = scalar_select %p113_p1, %s1213_s20, %s115_s25  }
   0x9   : > { %p1291_p5 = por %p126_p2, %p125_p0  ;;  %p1295_p6 = por %p132_p4, %p131_p3 }
   0xa   : > { %p908_p7 = scmp.ge.s32.totalorder %s1217_s21, 1  ;;  %p194_p8 = scmp.lt.s32.totalorder %s1217_s21, 3 }
   0xc   : > { %p195_p9 = pnand %p908_p7, %p194_p8 }
   0xd   : > { %v256_v0 = vld [vmem:[%s1558_s1] sm:$0xff] (!%p195_p9)  ;;  %v257_v1 = vld [vmem:[%s1558_s1 + $0x8] sm:$0xff] (!%p195_p9)  ;;  %v258_v2 = vld [vmem:[%s1558_s1 + $0x10] sm:$0xff] (!%p195_p9)  ;;  %s910_s11 = sshll.u32 (!%p195_p9), %s1274_s22, 4  ;;  %vm271_vm0 = vcmask (!%p195_p9), 523264   ;;  %s217_s13 = sand.u32 (!%p195_p9), 1, %s1209_s19  }
   0xe   : > { %198 = sbr.rel (%p195_p9) target bundleno = 613 (0x265), region = 36  ;;  %v1081_v3 = vpack.c.bf16 (!%p195_p9), %v257_v1, %v256_v0  ;;  %v259_v4 = vld [vmem:[%s1558_s1 + $0x18] sm:$0xff] (!%p195_p9)  ;;  %p228_p10 = scmp.lt.s32.totalorder (!%p195_p9), %s910_s11, 31  ;;  %v260_v6 = vld [vmem:[%s1558_s1 + $0x20] sm:$0xff] (!%p195_p9)  ;;  %v261_v7 = vld [vmem:[%s1558_s1 + $0x28] sm:$0xff] (!%p195_p9) }
   0xf   : > { %v1085_v5 = vpack.c.bf16 (!%p195_p9), %v259_v4, %v258_v2  ;;  %v1089_v8 = vpack.c.bf16 (!%p195_p9), %v261_v7, %v260_v6  ;;  %v262_v9 = vld [vmem:[%s1558_s1 + $0x30] sm:$0xff] (!%p195_p9)  ;;  %v263_v10 = vld [vmem:[%s1558_s1 + $0x38] sm:$0xff] (!%p195_p9)  ;;  %v497_v28 = vld [vmem:[%s1560_s3] sm:$0xff] (!%p195_p9)  ;;  %s909_s16 = sshll.u32 (!%p195_p9), %s217_s13, 7  ;;  %s1219_s25 = smov (!%p195_p9), 64  }
  0x10   : > { %1082 = vmatprep.subr.bf16.mxu0 (!%p195_p9), %v1081_v3  ;;  %v1093_v12 = vpack.c.bf16 (!%p195_p9), %v263_v10, %v262_v9  ;;  %v498_v29 = vld [vmem:[%s1560_s3 + $0x8] sm:$0xff] (!%p195_p9)  ;;  %v499_v30 = vld [vmem:[%s1560_s3 + $0x10] sm:$0xff] (!%p195_p9)  ;;  %v500_v32 = vld [vmem:[%s1560_s3 + $0x18] sm:$0xff] (!%p195_p9)  ;;  %s1402_s17 = scalar_lea.vmem (!%p195_p9), [#allocation2], %s909_s16  ;;  %s952_s26 = sshll.u32 (!%p195_p9), %s1274_s22, 11 }
  0x11   : > { %1084 = vmatpush3.bf16.msra.mxu0 (!%p195_p9), %v1081_v3  ;;  %v1097_v31 = vpack.c.bf16 (!%p195_p9), %v498_v29, %v497_v28  ;;  %v1101_v33 = vpack.c.bf16 (!%p195_p9), %v500_v32, %v499_v30  ;;  %v501_v34 = vld [vmem:[%s1560_s3 + $0x20] sm:$0xff] (!%p195_p9)  ;;  %v502_v35 = vld [vmem:[%s1560_s3 + $0x28] sm:$0xff] (!%p195_p9)  ;;  %v503_v37 = vld [vmem:[%s1560_s3 + $0x30] sm:$0xff] (!%p195_p9)  ;;  %s814_s30 = sshll.u32 (!%p195_p9), %s1402_s17, 4  ;;  %s1471_s8 = scalar_lea.hbm (!%p195_p9), %s1561_s4, %s952_s26  ;;  %s1473_s30 = int_to_ptr.vmem [resolvable:$true] %s814_s30 }
  0x12   : > { %1086 = vmatprep.subr.bf16.mxu0 (!%p195_p9), %v1085_v5  ;;  %v1105_v36 = vpack.c.bf16 (!%p195_p9), %v502_v35, %v501_v34  ;;  %v504_v38 = vld [vmem:[%s1560_s3 + $0x38] sm:$0xff] (!%p195_p9)  ;;  %v1396_v40 = vld [vmem:[%s1559_s2] ss:$0 sm:$0xff] (!%p195_p9)  ;;  %s1155_s10 = scalar_lea.vmem (!%p195_p9), %s1473_s30, 2048  ;;  %s1220_s22 = smov (!%p195_p9), [#allocation2]  }
  0x13   : > { %1098 = vmatprep.subr.bf16.mxu1 (!%p195_p9), %v1097_v31  ;;  %v1109_v39 = vpack.c.bf16 (!%p195_p9), %v504_v38, %v503_v37  ;;  %p1156_p11 = scmp.ne.s32.totalorder (!%p195_p9), %s1473_s30, %s1155_s10  ;;  %s1159_s12 = sshll.u32 (!%p195_p9), %s1220_s22, 4  ;;  %s1160_s12 = int_to_ptr.vmem [resolvable:$false] %s1159_s12 }
  0x14   : > { %1100 = vmatpush3.bf16.msra.mxu1 (!%p195_p9), %v1097_v31  ;;  %s1161_s14 = scalar_lea.vmem (!%p195_p9), %s1160_s12, 4096  ;;  %p1162_p0 = scmp.lt.s32.totalorder (!%p195_p9), %s1473_s30, %s1160_s12 }
  0x15   : > { %s1570_s11 = smov (!%p228_p10, %s910_s11), 31  ;;  %1088 = vmatpush3.bf16.msra.mxu0 %v1085_v5  ;;  %1102 = vmatprep.subr.bf16.mxu1 %v1101_v33  ;;  %p1157_p12 = pnand %p1156_p11, %p1291_p5 }
  0x16   : > { %s911_s23 = sshll.u32 %s1570_s11, 3  ;;  %1090 = vmatprep.subr.bf16.mxu0 %v1089_v8  ;;  %p1163_p1 = scmp.lt.s32.totalorder %s1161_s14, %s1155_s10 }
  0x17   : > { %s1334_s9 = scalar_lea.vmem %s1557_s0, %s911_s23  ;;  %p1158_p13 = pneg %p1157_p12 }
  0x18   : > { %v240_v11 = vld [vmem:[%s1334_s9] sm:$0xff]  ;;  %v241_v13 = vld [vmem:[%s1334_s9 + $0x8] sm:$0xff]  ;;  %v242_v14 = vld [vmem:[%s1334_s9 + $0x10] sm:$0xff]  ;;  %1104 = vmatpush3.bf16.msra.mxu1 %v1101_v33  ;;  %p1164_p2 = por %p1163_p1, %p1162_p0 }
  0x19   : > { %1017 = vmatprep.mubr.msk.f32.mxu0 %vm271_vm0, %v240_v11  ;;  %1092 = vmatpush3.bf16.msra.mxu0 %v1089_v8  ;;  %v243_v15 = vld [vmem:[%s1334_s9 + $0x18] sm:$0xff]  ;;  %v244_v16 = vld [vmem:[%s1334_s9 + $0x20] sm:$0xff]  ;;  %v245_v17 = vld [vmem:[%s1334_s9 + $0x28] sm:$0xff] }
  0x1a   : > { %1094 = vmatprep.subr.bf16.mxu0 %v1093_v12  ;;  %v246_v18 = vld [vmem:[%s1334_s9 + $0x30] sm:$0xff]  ;;  %v247_v19 = vld [vmem:[%s1334_s9 + $0x38] sm:$0xff]  ;;  %v248_v20 = vld [vmem:[%s1334_s9 + $0x40] sm:$0xff]  ;;  %1106 = vmatprep.subr.bf16.mxu1 %v1105_v36  ;;  %p1165_p3 = pnand %p1164_p2, %p1158_p13 }
  0x1b   : > { %v249_v21 = vld [vmem:[%s1334_s9 + $0x48] sm:$0xff]  ;;  %v250_v22 = vld [vmem:[%s1334_s9 + $0x50] sm:$0xff]  ;;  %v251_v23 = vld [vmem:[%s1334_s9 + $0x58] sm:$0xff] }
  0x1c   : > { %v252_v24 = vld [vmem:[%s1334_s9 + $0x60] sm:$0xff]  ;;  %v253_v25 = vld [vmem:[%s1334_s9 + $0x68] sm:$0xff]  ;;  %v254_v26 = vld [vmem:[%s1334_s9 + $0x70] sm:$0xff]  ;;  %1108 = vmatpush3.bf16.msra.mxu1 %v1105_v36 }
  0x1d   : > { %1096 = vmatpush3.bf16.msra.mxu0 %v1093_v12  ;;  %v255_v27 = vld [vmem:[%s1334_s9 + $0x78] sm:$0xff]  ;;  %1110 = vmatprep.subr.bf16.mxu1 %v1109_v39  ;;  %s1477_s9 = scalar_lea.sflag [#allocation3], %s217_s13 }
  0x20   : > { %1018 = vmatmul.mubr.msk.f32.vlgmr.msra.gmra.mrb[0].mxu0 %vm271_vm0, %v241_v13  ;;  %1112 = vmatpush3.bf16.msra.mxu1 %v1109_v39 }
  0x21   : > { %1020 = vmatprep.mubr.msk.f32.mxu0 %vm271_vm0, %v242_v14 }
  0x24   : > { %1021 = vmatmul.mubr.msk.f32.gmra.mrb[2].mxu0 %vm271_vm0, %v243_v15 }
  0x25   : > { %1023 = vmatprep.mubr.msk.f32.mxu0 %vm271_vm0, %v244_v16 }
  0x28   : > { %1024 = vmatmul.mubr.msk.f32.gmra.mrb[4].mxu0 %vm271_vm0, %v245_v17 }
  0x29   : > { %1026 = vmatprep.mubr.msk.f32.mxu0 %vm271_vm0, %v246_v18 }
  0x2c   : > { %1027 = vmatmul.mubr.msk.f32.gmra.mrb[6].mxu0 %vm271_vm0, %v247_v19 }
  0x2d   : > { %1029 = vmatprep.mubr.msk.f32.mxu0 %vm271_vm0, %v248_v20 }
  0x30   : > { %1030 = vmatmul.mubr.msk.f32.gmra.mrb[8].mxu0 %vm271_vm0, %v249_v21 }
  0x31   : > { %1032 = vmatprep.mubr.msk.f32.mxu0 %vm271_vm0, %v250_v22 }
  0x34   : > { %1033 = vmatmul.mubr.msk.f32.gmra.mrb[10].mxu0 %vm271_vm0, %v251_v23 }
  0x35   : > { %1035 = vmatprep.mubr.msk.f32.mxu0 %vm271_vm0, %v252_v24 }
  0x38   : > { %1036 = vmatmul.mubr.msk.f32.gmra.mrb[12].mxu0 %vm271_vm0, %v253_v25 }
  0x39   : > { %1038 = vmatprep.mubr.msk.f32.mxu0 %vm271_vm0, %v254_v26 }
  0x3c   : > { %1039 = vmatmul.mubr.msk.f32.gmra.mrb[14].mxu0 %vm271_vm0, %v255_v27 }
  0xf3   : > { %v1019_v41 = vpop.f32.mrb[0].mxu0 }
  0xf4   : > { %v392_v42 = vadd.f32 %v1019_v41, %v1396_v40  ;;  %v386_v43 = vpop.f32.mrb[1].mxu0 }
  0xf5   : > { %v387_v44 = vadd.f32 %v1396_v40, %v386_v43 }
  0xf6   : > { %v466_v45 = vmax.f32 %v392_v42, 0.0 }
  0xf7   : > { %v465_v46 = vmax.f32 %v387_v44, 0.0  ;;  %v1022_v47 = vpop.f32.mrb[2].mxu0 }
  0xf8   : > { %482 = vst [vmem:[%s1402_s17 + $0x8] sm:$0xff] %v466_v45  ;;  %v402_v48 = vadd.f32 %v1022_v47, %v1396_v40  ;;  %v396_v49 = vpop.f32.mrb[3].mxu0 }
  0xf9   : > { %481 = vst [vmem:[%s1402_s17] sm:$0xff] %v465_v46  ;;  %v397_v50 = vadd.f32 %v1396_v40, %v396_v49  ;;  %521 = vrot.lane.b32.xlu0 %v465_v46, %s1219_s25 }
  0xfa   : > { %v468_v51 = vmax.f32 %v402_v48, 0.0 }
  0xfb   : > { %v467_v52 = vmax.f32 %v397_v50, 0.0  ;;  %v1025_v53 = vpop.f32.mrb[4].mxu0 }
  0xfc   : > { %484 = vst [vmem:[%s1402_s17 + $0x18] sm:$0xff] %v468_v51  ;;  %v412_v54 = vadd.f32 %v1025_v53, %v1396_v40  ;;  %v406_v55 = vpop.f32.mrb[5].mxu0 }
  0xfd   : > { %483 = vst [vmem:[%s1402_s17 + $0x10] sm:$0xff] %v467_v52  ;;  %525 = vrot.lane.b32.xlu1 %v467_v52, %s1219_s25  ;;  %523 = vrot.lane.b32.xlu0 %v466_v45, %s1219_s25  ;;  %v407_v56 = vadd.f32 %v1396_v40, %v406_v55 }
  0xfe   : > { %v470_v57 = vmax.f32 %v412_v54, 0.0 }
  0xff   : > { %v469_v58 = vmax.f32 %v407_v56, 0.0  ;;  %v1028_v59 = vpop.f32.mrb[6].mxu0 }
 0x100   : > { %486 = vst [vmem:[%s1402_s17 + $0x28] sm:$0xff] %v470_v57  ;;  %v422_v60 = vadd.f32 %v1028_v59, %v1396_v40  ;;  %v416_v61 = vpop.f32.mrb[7].mxu0 }
 0x101   : > { %485 = vst [vmem:[%s1402_s17 + $0x20] sm:$0xff] %v469_v58  ;;  %527 = vrot.lane.b32.xlu1 %v468_v51, %s1219_s25  ;;  %v417_v62 = vadd.f32 %v1396_v40, %v416_v61  ;;  %529 = vrot.lane.b32.xlu0 %v469_v58, %s1219_s25 }
 0x102   : > { %v472_v63 = vmax.f32 %v422_v60, 0.0 }
 0x103   : > { %v471_v0 = vmax.f32 %v417_v62, 0.0  ;;  %v1031_v1 = vpop.f32.mrb[8].mxu0 }
 0x104   : > { %488 = vst [vmem:[%s1402_s17 + $0x38] sm:$0xff] %v472_v63  ;;  %v432_v2 = vadd.f32 %v1031_v1, %v1396_v40  ;;  %v426_v3 = vpop.f32.mrb[9].mxu0 }
 0x105   : > { %487 = vst [vmem:[%s1402_s17 + $0x30] sm:$0xff] %v471_v0  ;;  %531 = vrot.lane.b32.xlu1 %v470_v57, %s1219_s25  ;;  %v427_v4 = vadd.f32 %v1396_v40, %v426_v3  ;;  %533 = vrot.lane.b32.xlu0 %v471_v0, %s1219_s25 }
 0x106   : > { %v474_v5 = vmax.f32 %v432_v2, 0.0 }
 0x107   : > { %v473_v6 = vmax.f32 %v427_v4, 0.0  ;;  %v1034_v7 = vpop.f32.mrb[10].mxu0 }
 0x108   : > { %490 = vst [vmem:[%s1402_s17 + $0x48] sm:$0xff] %v474_v5  ;;  %v442_v8 = vadd.f32 %v1034_v7, %v1396_v40  ;;  %v436_v9 = vpop.f32.mrb[11].mxu0 }
 0x109   : > { %489 = vst [vmem:[%s1402_s17 + $0x40] sm:$0xff] %v473_v6  ;;  %535 = vrot.lane.b32.xlu1 %v472_v63, %s1219_s25  ;;  %v437_v10 = vadd.f32 %v1396_v40, %v436_v9  ;;  %537 = vrot.lane.b32.xlu0 %v473_v6, %s1219_s25 }
 0x10a   : > { %v476_v11 = vmax.f32 %v442_v8, 0.0 }
 0x10b   : > { %v475_v12 = vmax.f32 %v437_v10, 0.0  ;;  %v1037_v13 = vpop.f32.mrb[12].mxu0 }
 0x10c   : > { %492 = vst [vmem:[%s1402_s17 + $0x58] sm:$0xff] %v476_v11  ;;  %v452_v14 = vadd.f32 %v1037_v13, %v1396_v40  ;;  %v446_v15 = vpop.f32.mrb[13].mxu0 }
 0x10d   : > { %491 = vst [vmem:[%s1402_s17 + $0x50] sm:$0xff] %v475_v12  ;;  %539 = vrot.lane.b32.xlu1 %v474_v5, %s1219_s25  ;;  %v447_v16 = vadd.f32 %v1396_v40, %v446_v15  ;;  %541 = vrot.lane.b32.xlu0 %v475_v12, %s1219_s25 }
 0x10e   : > { %v478_v17 = vmax.f32 %v452_v14, 0.0 }
 0x10f   : > { %v477_v18 = vmax.f32 %v447_v16, 0.0  ;;  %v1040_v19 = vpop.f32.mrb[14].mxu0 }
 0x110   : > { %494 = vst [vmem:[%s1402_s17 + $0x68] sm:$0xff] %v478_v17  ;;  %v462_v20 = vadd.f32 %v1040_v19, %v1396_v40  ;;  %v456_v21 = vpop.f32.mrb[15].mxu0 }
 0x111   : > { %493 = vst [vmem:[%s1402_s17 + $0x60] sm:$0xff] %v477_v18  ;;  %543 = vrot.lane.b32.xlu1 %v476_v11, %s1219_s25  ;;  %v457_v22 = vadd.f32 %v1396_v40, %v456_v21  ;;  %545 = vrot.lane.b32.xlu0 %v477_v18, %s1219_s25 }
 0x112   : > { %v480_v23 = vmax.f32 %v462_v20, 0.0 }
 0x113   : > { %v479_v24 = vmax.f32 %v457_v22, 0.0 }
 0x114   : > { %496 = vst [vmem:[%s1402_s17 + $0x78] sm:$0xff] %v480_v23 }
 0x115   : > { %495 = vst [vmem:[%s1402_s17 + $0x70] sm:$0xff] %v479_v24  ;;  %547 = vrot.lane.b32.xlu1 %v478_v17, %s1219_s25  ;;  %549 = vrot.lane.b32.xlu0 %v479_v24, %s1219_s25 }
 0x119   : > { %551 = vrot.lane.b32.xlu1 %v480_v23, %s1219_s25 }
 0x16b   : > { %v522_v25 = vpop.permute.xlu0 %521 }
 0x16c   : > { %1057 = vmatprep.mubr.msk.f32.mxu1 %vm271_vm0, %v522_v25 }
 0x16f   : > { %v526_v26 = vpop.permute.xlu1 %525  ;;  %v524_v27 = vpop.permute.xlu0 %523 }
 0x170   : > { %1058 = vmatmul.mubr.msk.f32.vlgmr.msra.gmra.mrb[0].mxu1 %vm271_vm0, %v524_v27 }
 0x171   : > { %1060 = vmatprep.mubr.msk.f32.mxu1 %vm271_vm0, %v526_v26 }
 0x173   : > { %v528_v28 = vpop.permute.xlu1 %527  ;;  %v530_v29 = vpop.permute.xlu0 %529 }
 0x174   : > { %1061 = vmatmul.mubr.msk.f32.gmra.mrb[2].mxu1 %vm271_vm0, %v528_v28 }
 0x175   : > { %1063 = vmatprep.mubr.msk.f32.mxu1 %vm271_vm0, %v530_v29 }
 0x177   : > { %v532_v30 = vpop.permute.xlu1 %531  ;;  %v534_v31 = vpop.permute.xlu0 %533 }
 0x178   : > { %1064 = vmatmul.mubr.msk.f32.gmra.mrb[4].mxu1 %vm271_vm0, %v532_v30 }
 0x179   : > { %1066 = vmatprep.mubr.msk.f32.mxu1 %vm271_vm0, %v534_v31 }
 0x17b   : > { %v536_v32 = vpop.permute.xlu1 %535  ;;  %v538_v33 = vpop.permute.xlu0 %537 }
 0x17c   : > { %1067 = vmatmul.mubr.msk.f32.gmra.mrb[6].mxu1 %vm271_vm0, %v536_v32 }
 0x17d   : > { %1069 = vmatprep.mubr.msk.f32.mxu1 %vm271_vm0, %v538_v33 }
 0x17f   : > { %v540_v34 = vpop.permute.xlu1 %539  ;;  %v542_v35 = vpop.permute.xlu0 %541 }
 0x180   : > { %1070 = vmatmul.mubr.msk.f32.gmra.mrb[8].mxu1 %vm271_vm0, %v540_v34 }
 0x181   : > { %1072 = vmatprep.mubr.msk.f32.mxu1 %vm271_vm0, %v542_v35 }
 0x183   : > { %v544_v36 = vpop.permute.xlu1 %543  ;;  %v546_v37 = vpop.permute.xlu0 %545 }
 0x184   : > { %1073 = vmatmul.mubr.msk.f32.gmra.mrb[10].mxu1 %vm271_vm0, %v544_v36 }
 0x185   : > { %1075 = vmatprep.mubr.msk.f32.mxu1 %vm271_vm0, %v546_v37 }
 0x187   : > { %v548_v38 = vpop.permute.xlu1 %547  ;;  %v550_v39 = vpop.permute.xlu0 %549 }
 0x188   : > { %1076 = vmatmul.mubr.msk.f32.gmra.mrb[12].mxu1 %vm271_vm0, %v548_v38 }
 0x189   : > { %1078 = vmatprep.mubr.msk.f32.mxu1 %vm271_vm0, %v550_v39 }
 0x18b   : > { %v552_v40 = vpop.permute.xlu1 %551 }
 0x18c   : > { %1079 = vmatmul.mubr.msk.f32.gmra.mrb[14].mxu1 %vm271_vm0, %v552_v40 }
 0x18d   : > { %1168 = shalt.err (!%p1165_p3)
}
 0x18e   : > { %s1169_s13 = scalar_lea.hbm %s1471_s8, 2048  ;;  %s1173_s17 = scalar_lea.hbm %s1561_s4, 4096 }
 0x18f   : > { %p1170_p4 = scmp.ne.s32.totalorder %s1471_s8, %s1169_s13  ;;  %p1174_p9 = scmp.lt.u32.totalorder %s1471_s8, %s1561_s4 }
 0x190   : > { %p1175_p10 = scmp.lt.u32.totalorder %s1173_s17, %s1169_s13  ;;  %p1177_p12 = scmp.lt.u32.totalorder %s1169_s13, %s1471_s8 }
 0x191   : > { %p1171_p7 = pnand %p1170_p4, %p1291_p5 }
 0x192   : > { %p1176_p11 = por %p1175_p10, %p1174_p9 }
 0x193   : > { %p1172_p8 = pneg %p1171_p7 }
 0x194   : > { %p1178_p13 = por %p1177_p12, %p1176_p11 }
 0x196   : > { %p1179_p0 = pnand %p1178_p13, %p1172_p8 }
 0x198   : > { %1182 = shalt.err (!%p1179_p0)
}
 0x199   : > { %s1221_s6 = smov 128   ;;  %s1222_s7 = smov 8   ;;  %vm778_vm2 = vcmask 31744  }
 0x19a   : > { %1113 = dma.vmem_to_hbm [thread:$0]  (%p1291_p5), %s1473_s30, 2048, %s1471_s8, %s1477_s9, %s1221_s6, %s1221_s6, %s1222_s7  }
 0x19b   : > { %s1506_s12 = scalar_lea.vmem %s1562_s5, %s911_s23 }
 0x243   : > { %v1059_v41 = vpop.f32.mrb[0].mxu1 }
 0x244   : > { %vm731_vm1 = vcmp.ge.f32.partialorder %v1059_v41, 0.0  ;;  %v747_v42 = vmul.f32 0.2, %v1059_v41  ;;  %v651_v43 = vpop.f32.mrb[1].mxu1 }
 0x245   : > { %vm730_vm3 = vcmp.ge.f32.partialorder %v651_v43, 0.0  ;;  %v746_v44 = vmul.f32 0.2, %v651_v43 }
 0x246   : > { %v763_v45 = vsel %vm731_vm1, %v1059_v41, %v747_v42 }
 0x247   : > { %780 = vst.msk [vmem:[%s1506_s12 + $0x8] sm:$0xff] %vm778_vm2, %v763_v45  ;;  %v762_v46 = vsel %vm730_vm3, %v651_v43, %v746_v44  ;;  %v1062_v47 = vpop.f32.mrb[2].mxu1 }
 0x248   : > { %779 = vst.msk [vmem:[%s1506_s12] sm:$0xff] %vm778_vm2, %v762_v46  ;;  %vm733_vm4 = vcmp.ge.f32.partialorder %v1062_v47, 0.0  ;;  %v749_v48 = vmul.f32 0.2, %v1062_v47  ;;  %v661_v49 = vpop.f32.mrb[3].mxu1 }
 0x249   : > { %vm732_vm5 = vcmp.ge.f32.partialorder %v661_v49, 0.0  ;;  %v748_v50 = vmul.f32 0.2, %v661_v49 }
 0x24a   : > { %v765_v51 = vsel %vm733_vm4, %v1062_v47, %v749_v48 }
 0x24b   : > { %782 = vst.msk [vmem:[%s1506_s12 + $0x18] sm:$0xff] %vm778_vm2, %v765_v51  ;;  %v764_v52 = vsel %vm732_vm5, %v661_v49, %v748_v50  ;;  %v1065_v53 = vpop.f32.mrb[4].mxu1 }
 0x24c   : > { %781 = vst.msk [vmem:[%s1506_s12 + $0x10] sm:$0xff] %vm778_vm2, %v764_v52  ;;  %vm735_vm6 = vcmp.ge.f32.partialorder %v1065_v53, 0.0  ;;  %v751_v54 = vmul.f32 0.2, %v1065_v53  ;;  %v671_v55 = vpop.f32.mrb[5].mxu1 }
 0x24d   : > { %vm734_vm7 = vcmp.ge.f32.partialorder %v671_v55, 0.0  ;;  %v750_v56 = vmul.f32 0.2, %v671_v55 }
 0x24e   : > { %v767_v57 = vsel %vm735_vm6, %v1065_v53, %v751_v54 }
 0x24f   : > { %784 = vst.msk [vmem:[%s1506_s12 + $0x28] sm:$0xff] %vm778_vm2, %v767_v57  ;;  %v766_v58 = vsel %vm734_vm7, %v671_v55, %v750_v56  ;;  %v1068_v59 = vpop.f32.mrb[6].mxu1 }
 0x250   : > { %783 = vst.msk [vmem:[%s1506_s12 + $0x20] sm:$0xff] %vm778_vm2, %v766_v58  ;;  %vm737_vm8 = vcmp.ge.f32.partialorder %v1068_v59, 0.0  ;;  %v753_v60 = vmul.f32 0.2, %v1068_v59  ;;  %v681_v61 = vpop.f32.mrb[7].mxu1 }
 0x251   : > { %vm736_vm9 = vcmp.ge.f32.partialorder %v681_v61, 0.0  ;;  %v752_v62 = vmul.f32 0.2, %v681_v61 }
 0x252   : > { %v769_v63 = vsel %vm737_vm8, %v1068_v59, %v753_v60 }
 0x253   : > { %786 = vst.msk [vmem:[%s1506_s12 + $0x38] sm:$0xff] %vm778_vm2, %v769_v63  ;;  %v768_v0 = vsel %vm736_vm9, %v681_v61, %v752_v62  ;;  %v1071_v1 = vpop.f32.mrb[8].mxu1 }
 0x254   : > { %785 = vst.msk [vmem:[%s1506_s12 + $0x30] sm:$0xff] %vm778_vm2, %v768_v0  ;;  %vm739_vm10 = vcmp.ge.f32.partialorder %v1071_v1, 0.0  ;;  %v755_v2 = vmul.f32 0.2, %v1071_v1  ;;  %v691_v3 = vpop.f32.mrb[9].mxu1 }
 0x255   : > { %vm738_vm11 = vcmp.ge.f32.partialorder %v691_v3, 0.0  ;;  %v754_v4 = vmul.f32 0.2, %v691_v3 }
 0x256   : > { %v771_v5 = vsel %vm739_vm10, %v1071_v1, %v755_v2 }
 0x257   : > { %788 = vst.msk [vmem:[%s1506_s12 + $0x48] sm:$0xff] %vm778_vm2, %v771_v5  ;;  %v770_v6 = vsel %vm738_vm11, %v691_v3, %v754_v4  ;;  %v1074_v7 = vpop.f32.mrb[10].mxu1 }
 0x258   : > { %787 = vst.msk [vmem:[%s1506_s12 + $0x40] sm:$0xff] %vm778_vm2, %v770_v6  ;;  %vm741_vm12 = vcmp.ge.f32.partialorder %v1074_v7, 0.0  ;;  %v757_v8 = vmul.f32 0.2, %v1074_v7  ;;  %v701_v9 = vpop.f32.mrb[11].mxu1 }
 0x259   : > { %vm740_vm13 = vcmp.ge.f32.partialorder %v701_v9, 0.0  ;;  %v756_v10 = vmul.f32 0.2, %v701_v9 }
 0x25a   : > { %v773_v11 = vsel %vm741_vm12, %v1074_v7, %v757_v8 }
 0x25b   : > { %790 = vst.msk [vmem:[%s1506_s12 + $0x58] sm:$0xff] %vm778_vm2, %v773_v11  ;;  %v772_v12 = vsel %vm740_vm13, %v701_v9, %v756_v10  ;;  %v1077_v13 = vpop.f32.mrb[12].mxu1 }
 0x25c   : > { %789 = vst.msk [vmem:[%s1506_s12 + $0x50] sm:$0xff] %vm778_vm2, %v772_v12  ;;  %vm743_vm14 = vcmp.ge.f32.partialorder %v1077_v13, 0.0  ;;  %v759_v14 = vmul.f32 0.2, %v1077_v13  ;;  %v711_v15 = vpop.f32.mrb[13].mxu1 }
 0x25d   : > { %vm742_vm15 = vcmp.ge.f32.partialorder %v711_v15, 0.0  ;;  %v758_v16 = vmul.f32 0.2, %v711_v15 }
 0x25e   : > { %v775_v17 = vsel %vm743_vm14, %v1077_v13, %v759_v14 }
 0x25f   : > { %792 = vst.msk [vmem:[%s1506_s12 + $0x68] sm:$0xff] %vm778_vm2, %v775_v17  ;;  %v774_v18 = vsel %vm742_vm15, %v711_v15, %v758_v16  ;;  %v1080_v19 = vpop.f32.mrb[14].mxu1 }
 0x260   : > { %791 = vst.msk [vmem:[%s1506_s12 + $0x60] sm:$0xff] %vm778_vm2, %v774_v18  ;;  %vm745_vm0 = vcmp.ge.f32.partialorder %v1080_v19, 0.0  ;;  %v761_v20 = vmul.f32 0.2, %v1080_v19  ;;  %v721_v21 = vpop.f32.mrb[15].mxu1 }
 0x261   : > { %vm744_vm1 = vcmp.ge.f32.partialorder %v721_v21, 0.0  ;;  %v760_v22 = vmul.f32 0.2, %v721_v21 }
 0x262   : > { %v777_v23 = vsel %vm745_vm0, %v1080_v19, %v761_v20 }
 0x263   : > { %794 = vst.msk [vmem:[%s1506_s12 + $0x78] sm:$0xff] %vm778_vm2, %v777_v23  ;;  %v776_v24 = vsel %vm744_vm1, %v721_v21, %v760_v22 }
 0x264   : > { %793 = vst.msk [vmem:[%s1506_s12 + $0x70] sm:$0xff] %vm778_vm2, %v776_v24 }
 0x265 PF: > { %p1119_p5 = scmp.ge.s32.totalorder %s1217_s21, 2  ;;  %s833_s28 = sand.u32 1, %s1205_s18  }
 0x266   : > { %s834_s11 = scalar_lea.sflag [#allocation3], %s833_s28 }
 0x267   : > { %p1116_p1 = pnand %p1119_p5, %p1295_p6 }
 0x269   : > { %1200 = dma.done.wait (!%p1116_p1), %s834_s11, 2048  }
 0x26a   : > { %1202 = vsyncadd (!%p1116_p1), %s834_s11, 4294965248  ;;  %p16_p2 = scmp.ge.s32.totalorder %s1278_s24, 4   ;;  %s1565_s18 = smov %s1209_s19 }
 0x26b   : > { %s1566_s19 = smov %s1213_s20  ;;  %s1567_s20 = smov %s1289_s27 }
 0x26c   : > { %s1568_s21 = smov %s1278_s24  ;;  %18 = sbr.rel (!%p16_p2) target bundleno = 3 (0x3), region = 83 }
 0x273   :  { %847 = vsyncpa [#allocation3], 1 }
 0x274   :  { %849 = vsyncpa [#allocation3 + $0x1], 1 }

</bundles_post_ra>
